<compile_context>
chip_gen: v5e
topology: v5e:2x2
jax: 0.10.0
libtpu: 0.0.40
codegen_flags: <defaults>
</compile_context>

<pallas_src>
import functools

import jax
import jax.numpy as jnp
from jax.experimental import pallas as pl
from jax.experimental.pallas import tpu as pltpu

FEATS = 128


def mlp_kernel(x_ref, w1_ref, b1_ref, w2_ref, b2_ref, w3_ref, b3_ref, o_ref):
    # x_ref: (TB, 128); wK_ref: (128, 128) in (in, out) layout; bK_ref: (1, 128) f32.
    x = x_ref[...]
    # Hoist bias loads/broadcasts once per tile (JAX does not CSE broadcast_in_dim).
    b1 = b1_ref[...]
    b2 = b2_ref[...]
    b3 = b3_ref[...]

    h = jnp.dot(x, w1_ref[...], preferred_element_type=jnp.float32) + b1
    h = jnp.maximum(h, 0.0).astype(x.dtype)  # keep compute dtype (bf16 path) between layers

    h = jnp.dot(h, w2_ref[...], preferred_element_type=jnp.float32) + b2
    h = jnp.maximum(h, 0.0).astype(x.dtype)

    o_ref[...] = jnp.dot(h, w3_ref[...], preferred_element_type=jnp.float32) + b3


def prepare_params(params):
    """One-time param transform, done OUTSIDE the hot path:
    W (out, in) -> (in, out); b (128,) -> (1, 128)."""
    return tuple((w.T, b.reshape(1, FEATS)) for (w, b) in params)


@functools.partial(jax.jit, static_argnames=("tb", "compute_dtype"))
def mlp_forward(x, prepared_params, *, tb=2048, compute_dtype=jnp.float32):
    """x: any array with B rows and 128 total features after flattening.
    prepared_params: output of prepare_params(). compute_dtype=jnp.bfloat16 enables
    the native-MXU bf16 path (f32 accumulate, f32 bias/ReLU/output)."""
    B = x.shape[0]
    x2d = jnp.reshape(x.astype(jnp.float32), (B, -1))
    assert x2d.shape[1] == FEATS, "MLP expects 128 flattened features"

    (w1t, b1r), (w2t, b2r), (w3t, b3r) = prepared_params

    # Batch tile: multiple of 8 (sublane), large enough to sit near the HBM roofline,
    # capped by `tb`.  Pad B up to a multiple of TB so every tile is full (lane-dense,
    # unmasked stores); padded rows are sliced off at the end.
    TB = min(tb, max(8, ((B + 7) // 8) * 8))
    Bp = ((B + TB - 1) // TB) * TB
    if Bp != B:
        x2d = jnp.pad(x2d, ((0, Bp - B), (0, 0)))

    if compute_dtype != jnp.float32:
        x2d = x2d.astype(compute_dtype)
        w1t, w2t, w3t = (w.astype(compute_dtype) for w in (w1t, w2t, w3t))

    grid = (Bp // TB,)

    act_spec = pl.BlockSpec((TB, FEATS), lambda i: (i, 0))
    # Constant index_map -> weights/biases are DMA'd once and stay VMEM-resident.
    w_spec = pl.BlockSpec((FEATS, FEATS), lambda i: (0, 0))
    b_spec = pl.BlockSpec((1, FEATS), lambda i: (0, 0))

    # Explicit VMEM budget (double-buffered activation in+out, resident weights, headroom).
    itemsize = jnp.dtype(compute_dtype).itemsize
    vmem_bytes = (
        2 * TB * FEATS * itemsize      # double-buffered x tiles
        + 2 * TB * FEATS * 4           # double-buffered f32 output tiles
        + 2 * 3 * (FEATS * FEATS * itemsize + FEATS * 4)  # weights + biases (+ buffering slack)
        + (4 << 20)                    # scratch headroom
    )
    vmem_bytes = min(max(vmem_bytes, 32 << 20), 64 << 20)

    cost = pl.CostEstimate(
        flops=3 * 2 * Bp * FEATS * FEATS,
        transcendentals=0,
        bytes_accessed=Bp * FEATS * (itemsize + 4) + 3 * FEATS * FEATS * itemsize + 3 * FEATS * 4,
    )

    out = pl.pallas_call(
        mlp_kernel,
        out_shape=jax.ShapeDtypeStruct((Bp, FEATS), jnp.float32),
        grid=grid,
        in_specs=[act_spec, w_spec, b_spec, w_spec, b_spec, w_spec, b_spec],
        out_specs=act_spec,
        compiler_params=pltpu.CompilerParams(
            dimension_semantics=("parallel",),  # megacore: shard batch tiles across TCs (v7x)
            vmem_limit_bytes=int(vmem_bytes),
        ),
        cost_estimate=cost,
    )(x2d, w1t, b1r, w2t, b2r, w3t, b3r)

    return out[:B] if Bp != B else out


def init_params(key):
    """Deterministic init matching nn.Linear shapes: W (out,in)=(128,128), b (128,)."""
    ks = jax.random.split(key, 6)
    bound = 1.0 / jnp.sqrt(128.0)  # torch Linear default init range
    mk_w = lambda k: jax.random.uniform(k, (FEATS, FEATS), jnp.float32, -bound, bound)
    mk_b = lambda k: jax.random.uniform(k, (FEATS,), jnp.float32, -bound, bound)
    return [
        (mk_w(ks[0]), mk_b(ks[1])),
        (mk_w(ks[2]), mk_b(ks[3])),
        (mk_w(ks[4]), mk_b(ks[5])),
    ]


def mlp_reference(x, params):
    B = x.shape[0]
    out = jnp.reshape(x.astype(jnp.float32), (B, -1))
    (w1, b1), (w2, b2), (w3, b3) = params
    out = jnp.maximum(out @ w1.T + b1, 0.0)
    out = jnp.maximum(out @ w2.T + b2, 0.0)
    out = out @ w3.T + b3
    return out


if __name__ == "__main__":
    key = jax.random.PRNGKey(0)
    kx, kp = jax.random.split(key)

    # Small example input: batch=8, shaped (8, 2, 8, 8) -> flattens to (8, 128).
    x = jax.random.normal(kx, (8, 2, 8, 8), jnp.float32)
    params = init_params(kp)
    prepared = prepare_params(params)  # one-time weight transpose, outside the hot path

    out = mlp_forward(x, prepared)
    out = jax.block_until_ready(out)

    ref = mlp_reference(x, params)
    assert out.shape == (8, 128)
    assert jnp.allclose(out, ref, atol=1e-4, rtol=1e-4)

    # Also exercise a non-multiple batch to check the padding path.
    x2 = jax.random.normal(kx, (13, 128), jnp.float32)
    out2 = jax.block_until_ready(mlp_forward(x2, prepared))
    assert out2.shape == (13, 128)
    assert jnp.allclose(out2, mlp_reference(x2, params), atol=1e-4, rtol=1e-4)

    print("KERNEL_OK")
</pallas_src>

<mosaic_0001>
module attributes {stable_mosaic.version = 11 : i64} {
  func.func @mlp_kernel(%arg0: i32, %arg1: memref<8x128xf32, #tpu.memory_space<vmem>>, %arg2: memref<128x128xf32, #tpu.memory_space<vmem>>, %arg3: memref<1x128xf32, #tpu.memory_space<vmem>>, %arg4: memref<128x128xf32, #tpu.memory_space<vmem>>, %arg5: memref<1x128xf32, #tpu.memory_space<vmem>>, %arg6: memref<128x128xf32, #tpu.memory_space<vmem>>, %arg7: memref<1x128xf32, #tpu.memory_space<vmem>>, %arg8: memref<8x128xf32, #tpu.memory_space<vmem>>) attributes {dimension_semantics = [#tpu.dimension_semantics<parallel>], iteration_bounds = array<i64: 1>, scalar_prefetch = 0 : i64, scratch_operands = 0 : i64, tpu.core_type = #tpu.core_type<tc>, window_params = [{transform_indices = @transform_0, window_bounds = array<i64: 8, 128>}, {pipeline_mode = #tpu.pipeline_mode<synchronous>, transform_indices = @transform_1, window_bounds = array<i64: 128, 128>}, {pipeline_mode = #tpu.pipeline_mode<synchronous>, transform_indices = @transform_2, window_bounds = array<i64: 1, 128>}, {pipeline_mode = #tpu.pipeline_mode<synchronous>, transform_indices = @transform_3, window_bounds = array<i64: 128, 128>}, {pipeline_mode = #tpu.pipeline_mode<synchronous>, transform_indices = @transform_4, window_bounds = array<i64: 1, 128>}, {pipeline_mode = #tpu.pipeline_mode<synchronous>, transform_indices = @transform_5, window_bounds = array<i64: 128, 128>}, {pipeline_mode = #tpu.pipeline_mode<synchronous>, transform_indices = @transform_6, window_bounds = array<i64: 1, 128>}, {transform_indices = @transform_7, window_bounds = array<i64: 8, 128>}]} {
    %c0 = arith.constant 0 : index
    %c0_0 = arith.constant 0 : index
    %0 = vector.load %arg1[%c0, %c0_0] : memref<8x128xf32, #tpu.memory_space<vmem>>, vector<8x128xf32>
    %c0_1 = arith.constant 0 : index
    %c0_2 = arith.constant 0 : index
    %1 = vector.load %arg3[%c0_1, %c0_2] : memref<1x128xf32, #tpu.memory_space<vmem>>, vector<1x128xf32>
    %c0_3 = arith.constant 0 : index
    %c0_4 = arith.constant 0 : index
    %2 = vector.load %arg5[%c0_3, %c0_4] : memref<1x128xf32, #tpu.memory_space<vmem>>, vector<1x128xf32>
    %c0_5 = arith.constant 0 : index
    %c0_6 = arith.constant 0 : index
    %3 = vector.load %arg7[%c0_5, %c0_6] : memref<1x128xf32, #tpu.memory_space<vmem>>, vector<1x128xf32>
    %c0_7 = arith.constant 0 : index
    %c0_8 = arith.constant 0 : index
    %4 = vector.load %arg2[%c0_7, %c0_8] : memref<128x128xf32, #tpu.memory_space<vmem>>, vector<128x128xf32>
    %cst = arith.constant dense<0.000000e+00> : vector<8x128xf32>
    %5 = tpu.matmul %0, %4, %cst {dimension_numbers = #tpu.dot_dimension_numbers<[1], [0], [0], [1], [0, 0, 1, 1], [], []>} : vector<8x128xf32>, vector<128x128xf32>, vector<8x128xf32> -> vector<8x128xf32>
    %6 = vector.broadcast %1 : vector<1x128xf32> to vector<8x128xf32>
    %7 = arith.addf %5, %6 : vector<8x128xf32>
    %cst_9 = arith.constant 0.000000e+00 : f32
    %8 = vector.broadcast %cst_9 : f32 to vector<8x128xf32>
    %9 = arith.maximumf %7, %8 : vector<8x128xf32>
    %c0_10 = arith.constant 0 : index
    %c0_11 = arith.constant 0 : index
    %10 = vector.load %arg4[%c0_10, %c0_11] : memref<128x128xf32, #tpu.memory_space<vmem>>, vector<128x128xf32>
    %cst_12 = arith.constant dense<0.000000e+00> : vector<8x128xf32>
    %11 = tpu.matmul %9, %10, %cst_12 {dimension_numbers = #tpu.dot_dimension_numbers<[1], [0], [0], [1], [0, 0, 1, 1], [], []>} : vector<8x128xf32>, vector<128x128xf32>, vector<8x128xf32> -> vector<8x128xf32>
    %12 = vector.broadcast %2 : vector<1x128xf32> to vector<8x128xf32>
    %13 = arith.addf %11, %12 : vector<8x128xf32>
    %cst_13 = arith.constant 0.000000e+00 : f32
    %14 = vector.broadcast %cst_13 : f32 to vector<8x128xf32>
    %15 = arith.maximumf %13, %14 : vector<8x128xf32>
    %c0_14 = arith.constant 0 : index
    %c0_15 = arith.constant 0 : index
    %16 = vector.load %arg6[%c0_14, %c0_15] : memref<128x128xf32, #tpu.memory_space<vmem>>, vector<128x128xf32>
    %cst_16 = arith.constant dense<0.000000e+00> : vector<8x128xf32>
    %17 = tpu.matmul %15, %16, %cst_16 {dimension_numbers = #tpu.dot_dimension_numbers<[1], [0], [0], [1], [0, 0, 1, 1], [], []>} : vector<8x128xf32>, vector<128x128xf32>, vector<8x128xf32> -> vector<8x128xf32>
    %18 = vector.broadcast %3 : vector<1x128xf32> to vector<8x128xf32>
    %19 = arith.addf %17, %18 : vector<8x128xf32>
    %c0_17 = arith.constant 0 : index
    %c0_18 = arith.constant 0 : index
    %20 = vector.load %arg8[%c0_17, %c0_18] : memref<8x128xf32, #tpu.memory_space<vmem>>, vector<8x128xf32>
    tpu.vector_store %arg8[%c0_17, %c0_18], %19 {strides = array<i32>} : memref<8x128xf32, #tpu.memory_space<vmem>>, vector<8x128xf32>,
    return
  }
  func.func @transform_0(%arg0: i32) -> (i32, i32) {
    %c0_i32 = arith.constant 0 : i32
    %c0_i32_0 = arith.constant 0 : i32
    return %arg0, %c0_i32 : i32, i32
  }
  func.func @transform_1(%arg0: i32) -> (i32, i32) {
    %c0_i32 = arith.constant 0 : i32
    %c0_i32_0 = arith.constant 0 : i32
    %c0_i32_1 = arith.constant 0 : i32
    return %c0_i32, %c0_i32_0 : i32, i32
  }
  func.func @transform_2(%arg0: i32) -> (i32, i32) {
    %c0_i32 = arith.constant 0 : i32
    %c0_i32_0 = arith.constant 0 : i32
    %c0_i32_1 = arith.constant 0 : i32
    return %c0_i32, %c0_i32_0 : i32, i32
  }
  func.func @transform_3(%arg0: i32) -> (i32, i32) {
    %c0_i32 = arith.constant 0 : i32
    %c0_i32_0 = arith.constant 0 : i32
    %c0_i32_1 = arith.constant 0 : i32
    return %c0_i32, %c0_i32_0 : i32, i32
  }
  func.func @transform_4(%arg0: i32) -> (i32, i32) {
    %c0_i32 = arith.constant 0 : i32
    %c0_i32_0 = arith.constant 0 : i32
    %c0_i32_1 = arith.constant 0 : i32
    return %c0_i32, %c0_i32_0 : i32, i32
  }
  func.func @transform_5(%arg0: i32) -> (i32, i32) {
    %c0_i32 = arith.constant 0 : i32
    %c0_i32_0 = arith.constant 0 : i32
    %c0_i32_1 = arith.constant 0 : i32
    return %c0_i32, %c0_i32_0 : i32, i32
  }
  func.func @transform_6(%arg0: i32) -> (i32, i32) {
    %c0_i32 = arith.constant 0 : i32
    %c0_i32_0 = arith.constant 0 : i32
    %c0_i32_1 = arith.constant 0 : i32
    return %c0_i32, %c0_i32_0 : i32, i32
  }
  func.func @transform_7(%arg0: i32) -> (i32, i32) {
    %c0_i32 = arith.constant 0 : i32
    %c0_i32_0 = arith.constant 0 : i32
    return %arg0, %c0_i32 : i32, i32
  }
}

</mosaic_0001>

<bundles_post_ra>
// kernel: mlp_forward.1
= control target key start
LH: loop header
LB: loop body
LE: loop exit
PB: predicated region body
PF: predicated region fallthrough
CT: control target
= control target key end

     0   :  { %12 = vsyncpa [#allocation3], 0  ;;  %s401_s0 = inlined_call_operand.vmem [shape: f32[8,128], index: 0, kind: input, shape index: {}]   ;;  %s402_s1 = inlined_call_operand.vmem [shape: f32[128,128], index: 1, kind: input, shape index: {}]   ;;  %s403_s2 = inlined_call_operand.vmem [shape: f32[1,128], index: 2, kind: input, shape index: {}]   ;;  %s404_s3 = inlined_call_operand.hbm [shape: f32[128,128], index: 3, kind: input, shape index: {}]   ;;  %s405_s4 = inlined_call_operand.vmem [shape: f32[1,128], index: 4, kind: input, shape index: {}]   ;;  %s406_s5 = inlined_call_operand.hbm [shape: f32[128,128], index: 5, kind: input, shape index: {}]   ;;  %s407_s6 = inlined_call_operand.vmem [shape: f32[1,128], index: 6, kind: input, shape index: {}]   ;;  %s408_s7 = inlined_call_operand.hbm [shape: f32[8,128], index: 7, kind: output, shape index: {}]  }
   0x1   :  { %13 = vsyncpa [#allocation6], 0 }
   0x2   :  { %14 = vsyncpa [#allocation4], 0  ;;  %s25_s26 = sshll.u32 %s404_s3, 4  ;;  %s287_s27 = smov [#allocation2]   ;;  %s26_s26 = int_to_ptr.hbm [resolvable:$true] %s25_s26 }
   0x3   :  { %s27_s28 = sshll.u32 %s287_s27, 4  ;;  %s40_s8 = sshll.u32 %s406_s5, 4  ;;  %s28_s28 = int_to_ptr.vmem [resolvable:$true] %s27_s28  ;;  %s41_s8 = int_to_ptr.hbm [resolvable:$true] %s40_s8 }
   0x4   :  { %s288_s9 = smov 128   ;;  %s289_s10 = smov 8  }
   0x5   :  { %33 = dma.hbm_to_vmem [thread:$0]  %s26_s26, 2048, %s28_s28, [#allocation3], %s288_s9, %s288_s9, %s289_s10  }
   0x6   :  { %s290_s11 = smov [#allocation5]  }
   0x7   :  { %s42_s12 = sshll.u32 %s290_s11, 4  ;;  %s43_s12 = int_to_ptr.vmem [resolvable:$true] %s42_s12 }
   0x8   :  { %48 = dma.hbm_to_vmem [thread:$0]  %s41_s8, 2048, %s43_s12, [#allocation6], %s288_s9, %s288_s9, %s289_s10  }
   0x9   :  { %281 = dma.done.wait [#allocation3], 2048  }
   0xa   :  { %282 = vsyncadd [#allocation3], 4294965248 }
   0xb   :  { %283 = dma.done.wait [#allocation6], 2048  }
   0xc   :  { %284 = vsyncadd [#allocation6], 4294965248  ;;  %v78_v0 = vld [vmem:[%s402_s1 + $0x78] sm:$0xff]  ;;  %v77_v1 = vld [vmem:[%s402_s1 + $0x70] sm:$0xff]  ;;  %s291_s23 = smov [#allocation7]   ;;  %s190_s27 = sshll.u32 %s408_s7, 4  ;;  %s191_s27 = int_to_ptr.hbm [resolvable:$true] %s190_s27 }
   0xd   :  { %82 = vmatpush.msra.mxu0 %v78_v0  ;;  %v76_v2 = vld [vmem:[%s402_s1 + $0x68] sm:$0xff]  ;;  %v75_v3 = vld [vmem:[%s402_s1 + $0x60] sm:$0xff]  ;;  %v118_v4 = vld [vmem:[#allocation2 + $0x78] sm:$0xff]  ;;  %s188_s24 = sshll.u32 %s291_s23, 4  ;;  %s189_s24 = int_to_ptr.vmem [resolvable:$true] %s188_s24 }
   0xe   :  { %v74_v5 = vld [vmem:[%s402_s1 + $0x58] sm:$0xff]  ;;  %122 = vmatpush.msra.mxu1 %v118_v4  ;;  %v117_v6 = vld [vmem:[#allocation2 + $0x70] sm:$0xff]  ;;  %v116_v7 = vld [vmem:[#allocation2 + $0x68] sm:$0xff] }
   0xf   :  { %83 = vmatpush.msra.mxu0 %v77_v1  ;;  %v73_v8 = vld [vmem:[%s402_s1 + $0x50] sm:$0xff]  ;;  %v115_v9 = vld [vmem:[#allocation2 + $0x60] sm:$0xff]  ;;  %v72_v10 = vld [vmem:[%s402_s1 + $0x48] sm:$0xff] }
  0x10   :  { %123 = vmatpush.msra.mxu1 %v117_v6  ;;  %v114_v11 = vld [vmem:[#allocation2 + $0x58] sm:$0xff]  ;;  %v71_v12 = vld [vmem:[%s402_s1 + $0x40] sm:$0xff]  ;;  %v113_v13 = vld [vmem:[#allocation2 + $0x50] sm:$0xff] }
  0x11   :  { %84 = vmatpush.msra.mxu0 %v76_v2  ;;  %v70_v14 = vld [vmem:[%s402_s1 + $0x38] sm:$0xff]  ;;  %v112_v15 = vld [vmem:[#allocation2 + $0x48] sm:$0xff]  ;;  %v69_v16 = vld [vmem:[%s402_s1 + $0x30] sm:$0xff] }
  0x12   :  { %124 = vmatpush.msra.mxu1 %v116_v7  ;;  %v111_v17 = vld [vmem:[#allocation2 + $0x40] sm:$0xff]  ;;  %v68_v18 = vld [vmem:[%s402_s1 + $0x28] sm:$0xff]  ;;  %v110_v19 = vld [vmem:[#allocation2 + $0x38] sm:$0xff] }
  0x13   :  { %85 = vmatpush.msra.mxu0 %v75_v3  ;;  %v67_v20 = vld [vmem:[%s402_s1 + $0x20] sm:$0xff]  ;;  %v109_v21 = vld [vmem:[#allocation2 + $0x30] sm:$0xff]  ;;  %v66_v22 = vld [vmem:[%s402_s1 + $0x18] sm:$0xff] }
  0x14   :  { %125 = vmatpush.msra.mxu1 %v115_v9  ;;  %v108_v23 = vld [vmem:[#allocation2 + $0x28] sm:$0xff]  ;;  %v65_v24 = vld [vmem:[%s402_s1 + $0x10] sm:$0xff]  ;;  %v107_v25 = vld [vmem:[#allocation2 + $0x20] sm:$0xff] }
  0x15   :  { %86 = vmatpush.msra.mxu0 %v74_v5  ;;  %v64_v26 = vld [vmem:[%s402_s1 + $0x8] sm:$0xff]  ;;  %v106_v27 = vld [vmem:[#allocation2 + $0x18] sm:$0xff]  ;;  %v63_v28 = vld [vmem:[%s402_s1] sm:$0xff] }
  0x16   :  { %126 = vmatpush.msra.mxu1 %v114_v11  ;;  %v59_v29 = vld [vmem:[%s401_s0] sm:$0xff]  ;;  %v105_v30 = vld [vmem:[#allocation2 + $0x10] sm:$0xff]  ;;  %v104_v31 = vld [vmem:[#allocation2 + $0x8] sm:$0xff] }
  0x17   :  { %87 = vmatpush.msra.mxu0 %v73_v8  ;;  %v103_v32 = vld [vmem:[#allocation2] sm:$0xff]  ;;  %v158_v33 = vld [vmem:[#allocation5 + $0x78] sm:$0xff]  ;;  %v157_v34 = vld [vmem:[#allocation5 + $0x70] sm:$0xff] }
  0x18   :  { %127 = vmatpush.msra.mxu1 %v113_v13  ;;  %162 = vmatpush.msra.mxu2 %v158_v33  ;;  %v156_v35 = vld [vmem:[#allocation5 + $0x68] sm:$0xff]  ;;  %v155_v36 = vld [vmem:[#allocation5 + $0x60] sm:$0xff]  ;;  %v154_v37 = vld [vmem:[#allocation5 + $0x58] sm:$0xff] }
  0x19   :  { %88 = vmatpush.msra.mxu0 %v72_v10  ;;  %v153_v38 = vld [vmem:[#allocation5 + $0x50] sm:$0xff]  ;;  %v152_v39 = vld [vmem:[#allocation5 + $0x48] sm:$0xff]  ;;  %v151_v40 = vld [vmem:[#allocation5 + $0x40] sm:$0xff] }
  0x1a   :  { %128 = vmatpush.msra.mxu1 %v112_v15  ;;  %163 = vmatpush.msra.mxu2 %v157_v34  ;;  %v150_v41 = vld [vmem:[#allocation5 + $0x38] sm:$0xff]  ;;  %v149_v42 = vld [vmem:[#allocation5 + $0x30] sm:$0xff]  ;;  %v148_v43 = vld [vmem:[#allocation5 + $0x28] sm:$0xff] }
  0x1b   :  { %89 = vmatpush.msra.mxu0 %v71_v12  ;;  %v147_v44 = vld [vmem:[#allocation5 + $0x20] sm:$0xff]  ;;  %v146_v45 = vld [vmem:[#allocation5 + $0x18] sm:$0xff]  ;;  %v145_v50 = vld [vmem:[#allocation5 + $0x10] sm:$0xff] }
  0x1c   :  { %129 = vmatpush.msra.mxu1 %v111_v17  ;;  %164 = vmatpush.msra.mxu2 %v156_v35  ;;  %v206_v46 = vld [vmem:[%s403_s2] ss:$0 sm:$0xff]  ;;  %v144_v51 = vld [vmem:[#allocation5 + $0x8] sm:$0xff] }
  0x1d   :  { %90 = vmatpush.msra.mxu0 %v70_v14  ;;  %v143_v52 = vld [vmem:[#allocation5] sm:$0xff] }
  0x1e   :  { %130 = vmatpush.msra.mxu1 %v110_v19  ;;  %165 = vmatpush.msra.mxu2 %v155_v36  ;;  %v207_v53 = vld [vmem:[%s405_s4] ss:$0 sm:$0xff] }
  0x1f   :  { %91 = vmatpush.msra.mxu0 %v69_v16  ;;  %v208_v57 = vld [vmem:[%s407_s6] ss:$0 sm:$0xff] }
  0x20   :  { %131 = vmatpush.msra.mxu1 %v109_v21  ;;  %166 = vmatpush.msra.mxu2 %v154_v37 }
  0x21   :  { %92 = vmatpush.msra.mxu0 %v68_v18 }
  0x22   :  { %132 = vmatpush.msra.mxu1 %v108_v23  ;;  %167 = vmatpush.msra.mxu2 %v153_v38 }
  0x23   :  { %93 = vmatpush.msra.mxu0 %v67_v20 }
  0x24   :  { %133 = vmatpush.msra.mxu1 %v107_v25  ;;  %168 = vmatpush.msra.mxu2 %v152_v39 }
  0x25   :  { %94 = vmatpush.msra.mxu0 %v66_v22 }
  0x26   :  { %134 = vmatpush.msra.mxu1 %v106_v27  ;;  %169 = vmatpush.msra.mxu2 %v151_v40 }
  0x27   :  { %95 = vmatpush.msra.mxu0 %v65_v24 }
  0x28   :  { %135 = vmatpush.msra.mxu1 %v105_v30  ;;  %170 = vmatpush.msra.mxu2 %v150_v41 }
  0x29   :  { %96 = vmatpush.msra.mxu0 %v64_v26 }
  0x2a   :  { %136 = vmatpush.msra.mxu1 %v104_v31  ;;  %171 = vmatpush.msra.mxu2 %v149_v42 }
  0x2b   :  { %97 = vmatpush.msra.mxu0 %v63_v28 }
  0x2c   :  { %98 = vmatmul.f32.vlgmr.msra.gmra.mxu0 %v59_v29  ;;  %137 = vmatpush.msra.mxu1 %v103_v32 }
  0x2d   :  { %172 = vmatpush.msra.mxu2 %v148_v43 }
  0x2f   :  { %173 = vmatpush.msra.mxu2 %v147_v44 }
  0x31   :  { %174 = vmatpush.msra.mxu2 %v146_v45 }
  0x33   :  { %175 = vmatpush.msra.mxu2 %v145_v50 }
  0x35   :  { %176 = vmatpush.msra.mxu2 %v144_v51 }
  0x37   :  { %177 = vmatpush.msra.mxu2 %v143_v52 }
  0xa9   :  { %v99_v47 = vpop.f32.mrf.mxu0 }
  0xaa   :  { %v100_v48 = vadd.f32 %v206_v46, %v99_v47 }
  0xac   :  { %v102_v49 = vmax.f32 %v100_v48, 0.0 }
  0xae   :  { %138 = vmatmul.f32.vlgmr.msra.gmra.mxu1 %v102_v49 }
 0x12b   :  { %v139_v54 = vpop.f32.mrf.mxu1 }
 0x12c   :  { %v140_v55 = vadd.f32 %v207_v53, %v139_v54 }
 0x12e   :  { %v142_v56 = vmax.f32 %v140_v55, 0.0 }
 0x130   :  { %178 = vmatmul.f32.vlgmr.msra.gmra.mxu2 %v142_v56 }
 0x1b3   :  { %v179_v58 = vpop.f32.mrf.mxu2 }
 0x1b4   :  { %v180_v59 = vadd.f32 %v208_v57, %v179_v58 }
 0x1b6   :  { %182 = vst [vmem:[#allocation7] sm:$0xff] %v180_v59 }
 0x1b7   :  { %193 = dma.vmem_to_hbm [thread:$0]  %s189_s24, 128, %s191_s27, [#allocation4]  }
 0x1b8   :  { %285 = dma.done.wait [#allocation4], 128  }
 0x1b9   :  { %286 = vsyncadd [#allocation4], 4294967168 }
 0x1ba   :  { %198 = vsyncpa [#allocation3], 1 }
 0x1bb   :  { %199 = vsyncpa [#allocation6], 1 }
 0x1bc   :  { %200 = vsyncpa [#allocation4], 1 }

</bundles_post_ra>
